<compile_context>
chip_gen: v6e
topology: v6e:2x2x1
jax: 0.10.0
libtpu: 0.0.40
codegen_flags: <defaults>
</compile_context>

<pallas_src>
import jax
import jax.numpy as jnp
from jax import lax
from jax.experimental import pallas as pl
from jax.experimental.pallas import tpu as pltpu


def _round_up(x, m):
    return (x + m - 1) // m * m


# ----------------------------- Pallas kernel -------------------------------
def spectral_resnet_kernel(x_ref, w1_ref, b1_ref, wr_ref, br_ref,
                           w2_ref, b2_ref, out_ref):
    # x_ref : (TB, IN_P)                         one batch tile
    # w1_ref: (IN_P, F_P)        b1_ref: (1, F_P)
    # wr_ref: (n_res, F_P, F_P)  br_ref: (n_res, 1, F_P)
    # w2_ref: (F_P, C_P)         b2_ref: (1, C_P)
    # out_ref: (TB, C_P)
    w_dtype = w1_ref.dtype
    x = x_ref[...]

    # First Linear + ReLU (fp32 accumulation on the MXU, elementwise in fp32).
    h = jnp.dot(x, w1_ref[...], preferred_element_type=jnp.float32) + b1_ref[...]
    h = jnp.maximum(h, 0.0)

    # Residual SpectralLinear layers: h = relu(h @ Wr + br) + h
    n_res = wr_ref.shape[0]

    def body(i, h):
        r = jnp.dot(h.astype(w_dtype), wr_ref[i],
                    preferred_element_type=jnp.float32) + br_ref[i]
        return jnp.maximum(r, 0.0) + h

    h = lax.fori_loop(0, n_res, body, h, unroll=True)

    # Last Linear -> lane-dense (padded) output, unmasked stores.
    out_ref[...] = (jnp.dot(h.astype(w_dtype), w2_ref[...],
                            preferred_element_type=jnp.float32) + b2_ref[...])


def spectral_tabular_resnet(x, w1, b1, wr, br, w2, b2,
                            compute_dtype=jnp.float32):
    """Runs the fused forward pass. compute_dtype may be bf16 (fp32 accum)."""
    B, in_features = x.shape
    F = w1.shape[1]
    C = w2.shape[1]
    n_res = wr.shape[0]

    # Lane / sublane friendly padded sizes.
    IN_P = _round_up(in_features, 128)
    F_P = _round_up(F, 128)
    C_P = _round_up(C, 128)
    TB = 256 if B > 128 else 128          # batch tile: fill the MXU M dimension
    B_P = _round_up(max(B, TB), TB)

    cdt = jnp.dtype(compute_dtype)

    # Zero-pad inputs / parameters (zeros are exact no-ops through the network).
    xp = jnp.zeros((B_P, IN_P), cdt).at[:B, :in_features].set(x.astype(cdt))
    w1p = jnp.zeros((IN_P, F_P), cdt).at[:in_features, :F].set(w1.astype(cdt))
    b1p = jnp.zeros((1, F_P), jnp.float32).at[:, :F].set(b1.astype(jnp.float32))
    wrp = jnp.zeros((n_res, F_P, F_P), cdt).at[:, :F, :F].set(wr.astype(cdt))
    brp = jnp.zeros((n_res, 1, F_P), jnp.float32).at[:, :, :F].set(
        br.astype(jnp.float32))
    w2p = jnp.zeros((F_P, C_P), cdt).at[:F, :C].set(w2.astype(cdt))
    b2p = jnp.zeros((1, C_P), jnp.float32).at[:, :C].set(b2.astype(jnp.float32))

    # VMEM budget: resident weights + double-buffered x/out blocks + activations.
    w_item = cdt.itemsize
    weight_bytes = (IN_P * F_P + n_res * F_P * F_P + F_P * C_P) * w_item
    bias_bytes = ((n_res + 1) * F_P + C_P) * 4
    io_bytes = 2 * TB * (IN_P * w_item + C_P * 4)
    act_bytes = 4 * TB * F_P * 4
    vmem_limit = int(1.5 * (weight_bytes + bias_bytes + io_bytes + act_bytes))
    vmem_limit = max(32 << 20, min(vmem_limit + (4 << 20), 64 << 20))

    grid = (B_P // TB,)
    in_specs = [
        pl.BlockSpec((TB, IN_P), lambda i: (i, 0)),          # x: moves per step
        pl.BlockSpec((IN_P, F_P), lambda i: (0, 0)),          # weights: resident
        pl.BlockSpec((1, F_P), lambda i: (0, 0)),
        pl.BlockSpec((n_res, F_P, F_P), lambda i: (0, 0, 0)),
        pl.BlockSpec((n_res, 1, F_P), lambda i: (0, 0, 0)),
        pl.BlockSpec((F_P, C_P), lambda i: (0, 0)),
        pl.BlockSpec((1, C_P), lambda i: (0, 0)),
    ]
    out_specs = pl.BlockSpec((TB, C_P), lambda i: (i, 0))

    out_pad = pl.pallas_call(
        spectral_resnet_kernel,
        out_shape=jax.ShapeDtypeStruct((B_P, C_P), jnp.float32),
        grid=grid,
        in_specs=in_specs,
        out_specs=out_specs,
        compiler_params=pltpu.CompilerParams(
            dimension_semantics=("parallel",),
            vmem_limit_bytes=vmem_limit),
    )(xp, w1p, b1p, wrp, brp, w2p, b2p)

    return out_pad[:B, :C]


# ----------------------- parameter setup (plain JAX) ------------------------
def linear_init(key, fan_in, fan_out):
    # torch nn.Linear default: U(-1/sqrt(fan_in), 1/sqrt(fan_in))
    kw, kb = jax.random.split(key)
    bound = 1.0 / jnp.sqrt(fan_in)
    w = jax.random.uniform(kw, (fan_in, fan_out), jnp.float32, -bound, bound)
    b = jax.random.uniform(kb, (1, fan_out), jnp.float32, -bound, bound)
    return w, b


def spectral_normalize(w, key, norm_bound=1.0, n_power_iterations=1):
    # w: (in, out).  Power iteration on the 2-norm, soft bound (sigma <= bound).
    u = jax.random.normal(key, (w.shape[1],), jnp.float32)
    u = u / (jnp.linalg.norm(u) + 1e-12)
    for _ in range(n_power_iterations):
        v = w @ u
        v = v / (jnp.linalg.norm(v) + 1e-12)
        u = w.T @ v
        u = u / (jnp.linalg.norm(u) + 1e-12)
    sigma = v @ (w @ u)
    factor = jnp.maximum(1.0, sigma / norm_bound)
    return w / factor


def make_params(key, in_features, feature_dim, num_classes,
                n_residual_layers=2, spectral_norm=True,
                norm_bound=1.0, n_power_iterations=1):
    keys = jax.random.split(key, 2 + 2 * n_residual_layers)
    w1, b1 = linear_init(keys[0], in_features, feature_dim)
    w2, b2 = linear_init(keys[1], feature_dim, num_classes)

    wr_list, br_list = [], []
    for i in range(n_residual_layers):
        w, b = linear_init(keys[2 + 2 * i], feature_dim, feature_dim)
        if spectral_norm:
            w = spectral_normalize(w, keys[3 + 2 * i],
                                   norm_bound=norm_bound,
                                   n_power_iterations=n_power_iterations)
        wr_list.append(w)
        br_list.append(b)
    wr = jnp.stack(wr_list, axis=0)            # (n_res, feat, feat)
    br = jnp.stack(br_list, axis=0)            # (n_res, 1, feat)
    return w1, b1, wr, br, w2, b2


# ----------------------------- reference (JAX) ------------------------------
def reference_forward(x, w1, b1, wr, br, w2, b2):
    h = jnp.maximum(x @ w1 + b1, 0.0)
    for i in range(wr.shape[0]):
        h = jnp.maximum(h @ wr[i] + br[i], 0.0) + h
    return h @ w2 + b2


if __name__ == "__main__":
    key = jax.random.PRNGKey(0)
    k_x, k_p, k_x2 = jax.random.split(key, 3)

    in_features, feature_dim, num_classes = 16, 128, 10
    n_residual_layers = 2
    params = make_params(k_p, in_features, feature_dim, num_classes,
                         n_residual_layers=n_residual_layers,
                         spectral_norm=True, norm_bound=1.0,
                         n_power_iterations=1)

    # -- small batch (single grid step, batch padded to a full 128-row MXU tile)
    B = 8
    x = jax.random.normal(k_x, (B, in_features), jnp.float32)
    out = jax.block_until_ready(spectral_tabular_resnet(x, *params))
    ref = reference_forward(x, *params)
    assert out.shape == (B, num_classes)
    assert jnp.allclose(out, ref, atol=1e-4, rtol=1e-4), "fp32 mismatch (B=8)"

    # -- larger, non-tile-aligned batch: exercises the pipelined batch grid ----
    B2 = 272
    x2 = jax.random.normal(k_x2, (B2, in_features), jnp.float32)
    out2 = jax.block_until_ready(spectral_tabular_resnet(x2, *params))
    ref2 = reference_forward(x2, *params)
    assert out2.shape == (B2, num_classes)
    assert jnp.allclose(out2, ref2, atol=1e-4, rtol=1e-4), "fp32 mismatch (B=272)"

    # -- bf16 weights/activations with fp32 accumulation (v6e/v7x fast path) ---
    out_bf = jax.block_until_ready(
        spectral_tabular_resnet(x2, *params, compute_dtype=jnp.bfloat16))
    assert out_bf.shape == (B2, num_classes)
    assert bool(jnp.all(jnp.isfinite(out_bf)))
    assert float(jnp.max(jnp.abs(out_bf - ref2))) < 0.5, "bf16 path diverged"

    print("KERNEL_OK")
</pallas_src>

<mosaic_0001>
module attributes {stable_mosaic.version = 11 : i64} {
  func.func @spectral_resnet_kernel(%arg0: i32, %arg1: memref<128x128xf32, #tpu.memory_space<vmem>>, %arg2: memref<128x128xf32, #tpu.memory_space<vmem>>, %arg3: memref<1x128xf32, #tpu.memory_space<vmem>>, %arg4: memref<2x128x128xf32, #tpu.memory_space<vmem>>, %arg5: memref<2x1x128xf32, #tpu.memory_space<vmem>>, %arg6: memref<128x128xf32, #tpu.memory_space<vmem>>, %arg7: memref<1x128xf32, #tpu.memory_space<vmem>>, %arg8: memref<128x128xf32, #tpu.memory_space<vmem>>) attributes {dimension_semantics = [#tpu.dimension_semantics<parallel>], iteration_bounds = array<i64: 1>, scalar_prefetch = 0 : i64, scratch_operands = 0 : i64, tpu.core_type = #tpu.core_type<tc>, window_params = [{transform_indices = @transform_0, window_bounds = array<i64: 128, 128>}, {pipeline_mode = #tpu.pipeline_mode<synchronous>, transform_indices = @transform_1, window_bounds = array<i64: 128, 128>}, {pipeline_mode = #tpu.pipeline_mode<synchronous>, transform_indices = @transform_2, window_bounds = array<i64: 1, 128>}, {pipeline_mode = #tpu.pipeline_mode<synchronous>, transform_indices = @transform_3, window_bounds = array<i64: 2, 128, 128>}, {pipeline_mode = #tpu.pipeline_mode<synchronous>, transform_indices = @transform_4, window_bounds = array<i64: 2, 1, 128>}, {pipeline_mode = #tpu.pipeline_mode<synchronous>, transform_indices = @transform_5, window_bounds = array<i64: 128, 128>}, {pipeline_mode = #tpu.pipeline_mode<synchronous>, transform_indices = @transform_6, window_bounds = array<i64: 1, 128>}, {transform_indices = @transform_7, window_bounds = array<i64: 128, 128>}]} {
    %c0 = arith.constant 0 : index
    %c0_0 = arith.constant 0 : index
    %0 = vector.load %arg1[%c0, %c0_0] : memref<128x128xf32, #tpu.memory_space<vmem>>, vector<128x128xf32>
    %c0_1 = arith.constant 0 : index
    %c0_2 = arith.constant 0 : index
    %1 = vector.load %arg2[%c0_1, %c0_2] : memref<128x128xf32, #tpu.memory_space<vmem>>, vector<128x128xf32>
    %cst = arith.constant dense<0.000000e+00> : vector<128x128xf32>
    %2 = tpu.matmul %0, %1, %cst {dimension_numbers = #tpu.dot_dimension_numbers<[1], [0], [0], [1], [0, 0, 1, 1], [], []>} : vector<128x128xf32>, vector<128x128xf32>, vector<128x128xf32> -> vector<128x128xf32>
    %c0_3 = arith.constant 0 : index
    %c0_4 = arith.constant 0 : index
    %3 = vector.load %arg3[%c0_3, %c0_4] : memref<1x128xf32, #tpu.memory_space<vmem>>, vector<1x128xf32>
    %4 = vector.broadcast %3 : vector<1x128xf32> to vector<128x128xf32>
    %5 = arith.addf %2, %4 : vector<128x128xf32>
    %cst_5 = arith.constant 0.000000e+00 : f32
    %6 = vector.broadcast %cst_5 : f32 to vector<128x128xf32>
    %7 = arith.maximumf %5, %6 : vector<128x128xf32>
    %c0_i32 = arith.constant 0 : i32
    %8 = arith.index_cast %c0_i32 : i32 to index
    %c0_6 = arith.constant 0 : index
    %c0_7 = arith.constant 0 : index
    %9 = vector.load %arg4[%8, %c0_6, %c0_7] : memref<2x128x128xf32, #tpu.memory_space<vmem>>, vector<1x128x128xf32>
    %10 = vector.shape_cast %9 : vector<1x128x128xf32> to vector<128x128xf32>
    %cst_8 = arith.constant dense<0.000000e+00> : vector<128x128xf32>
    %11 = tpu.matmul %7, %10, %cst_8 {dimension_numbers = #tpu.dot_dimension_numbers<[1], [0], [0], [1], [0, 0, 1, 1], [], []>} : vector<128x128xf32>, vector<128x128xf32>, vector<128x128xf32> -> vector<128x128xf32>
    %12 = arith.index_cast %c0_i32 : i32 to index
    %c0_9 = arith.constant 0 : index
    %c0_10 = arith.constant 0 : index
    %13 = vector.load %arg5[%12, %c0_9, %c0_10] : memref<2x1x128xf32, #tpu.memory_space<vmem>>, vector<1x1x128xf32>
    %14 = vector.shape_cast %13 : vector<1x1x128xf32> to vector<1x128xf32>
    %15 = vector.broadcast %14 : vector<1x128xf32> to vector<128x128xf32>
    %16 = arith.addf %11, %15 : vector<128x128xf32>
    %cst_11 = arith.constant 0.000000e+00 : f32
    %17 = vector.broadcast %cst_11 : f32 to vector<128x128xf32>
    %18 = arith.maximumf %16, %17 : vector<128x128xf32>
    %19 = arith.addf %18, %7 : vector<128x128xf32>
    %c1_i32 = arith.constant 1 : i32
    %20 = arith.index_cast %c1_i32 : i32 to index
    %c0_12 = arith.constant 0 : index
    %c0_13 = arith.constant 0 : index
    %21 = vector.load %arg4[%20, %c0_12, %c0_13] : memref<2x128x128xf32, #tpu.memory_space<vmem>>, vector<1x128x128xf32>
    %22 = vector.shape_cast %21 : vector<1x128x128xf32> to vector<128x128xf32>
    %cst_14 = arith.constant dense<0.000000e+00> : vector<128x128xf32>
    %23 = tpu.matmul %19, %22, %cst_14 {dimension_numbers = #tpu.dot_dimension_numbers<[1], [0], [0], [1], [0, 0, 1, 1], [], []>} : vector<128x128xf32>, vector<128x128xf32>, vector<128x128xf32> -> vector<128x128xf32>
    %24 = arith.index_cast %c1_i32 : i32 to index
    %c0_15 = arith.constant 0 : index
    %c0_16 = arith.constant 0 : index
    %25 = vector.load %arg5[%24, %c0_15, %c0_16] : memref<2x1x128xf32, #tpu.memory_space<vmem>>, vector<1x1x128xf32>
    %26 = vector.shape_cast %25 : vector<1x1x128xf32> to vector<1x128xf32>
    %27 = vector.broadcast %26 : vector<1x128xf32> to vector<128x128xf32>
    %28 = arith.addf %23, %27 : vector<128x128xf32>
    %cst_17 = arith.constant 0.000000e+00 : f32
    %29 = vector.broadcast %cst_17 : f32 to vector<128x128xf32>
    %30 = arith.maximumf %28, %29 : vector<128x128xf32>
    %31 = arith.addf %30, %19 : vector<128x128xf32>
    %c2_i32 = arith.constant 2 : i32
    %c0_18 = arith.constant 0 : index
    %c0_19 = arith.constant 0 : index
    %32 = vector.load %arg6[%c0_18, %c0_19] : memref<128x128xf32, #tpu.memory_space<vmem>>, vector<128x128xf32>
    %cst_20 = arith.constant dense<0.000000e+00> : vector<128x128xf32>
    %33 = tpu.matmul %31, %32, %cst_20 {dimension_numbers = #tpu.dot_dimension_numbers<[1], [0], [0], [1], [0, 0, 1, 1], [], []>} : vector<128x128xf32>, vector<128x128xf32>, vector<128x128xf32> -> vector<128x128xf32>
    %c0_21 = arith.constant 0 : index
    %c0_22 = arith.constant 0 : index
    %34 = vector.load %arg7[%c0_21, %c0_22] : memref<1x128xf32, #tpu.memory_space<vmem>>, vector<1x128xf32>
    %35 = vector.broadcast %34 : vector<1x128xf32> to vector<128x128xf32>
    %36 = arith.addf %33, %35 : vector<128x128xf32>
    %c0_23 = arith.constant 0 : index
    %c0_24 = arith.constant 0 : index
    %37 = vector.load %arg8[%c0_23, %c0_24] : memref<128x128xf32, #tpu.memory_space<vmem>>, vector<128x128xf32>
    tpu.vector_store %arg8[%c0_23, %c0_24], %36 {strides = array<i32>} : memref<128x128xf32, #tpu.memory_space<vmem>>, vector<128x128xf32>,
    return
  }
  func.func @transform_0(%arg0: i32) -> (i32, i32) {
    %c0_i32 = arith.constant 0 : i32
    %c0_i32_0 = arith.constant 0 : i32
    return %arg0, %c0_i32 : i32, i32
  }
  func.func @transform_1(%arg0: i32) -> (i32, i32) {
    %c0_i32 = arith.constant 0 : i32
    %c0_i32_0 = arith.constant 0 : i32
    %c0_i32_1 = arith.constant 0 : i32
    return %c0_i32, %c0_i32_0 : i32, i32
  }
  func.func @transform_2(%arg0: i32) -> (i32, i32) {
    %c0_i32 = arith.constant 0 : i32
    %c0_i32_0 = arith.constant 0 : i32
    %c0_i32_1 = arith.constant 0 : i32
    return %c0_i32, %c0_i32_0 : i32, i32
  }
  func.func @transform_3(%arg0: i32) -> (i32, i32, i32) {
    %c0_i32 = arith.constant 0 : i32
    %c0_i32_0 = arith.constant 0 : i32
    %c0_i32_1 = arith.constant 0 : i32
    %c0_i32_2 = arith.constant 0 : i32
    return %c0_i32, %c0_i32_0, %c0_i32_1 : i32, i32, i32
  }
  func.func @transform_4(%arg0: i32) -> (i32, i32, i32) {
    %c0_i32 = arith.constant 0 : i32
    %c0_i32_0 = arith.constant 0 : i32
    %c0_i32_1 = arith.constant 0 : i32
    %c0_i32_2 = arith.constant 0 : i32
    return %c0_i32, %c0_i32_0, %c0_i32_1 : i32, i32, i32
  }
  func.func @transform_5(%arg0: i32) -> (i32, i32) {
    %c0_i32 = arith.constant 0 : i32
    %c0_i32_0 = arith.constant 0 : i32
    %c0_i32_1 = arith.constant 0 : i32
    return %c0_i32, %c0_i32_0 : i32, i32
  }
  func.func @transform_6(%arg0: i32) -> (i32, i32) {
    %c0_i32 = arith.constant 0 : i32
    %c0_i32_0 = arith.constant 0 : i32
    %c0_i32_1 = arith.constant 0 : i32
    return %c0_i32, %c0_i32_0 : i32, i32
  }
  func.func @transform_7(%arg0: i32) -> (i32, i32) {
    %c0_i32 = arith.constant 0 : i32
    %c0_i32_0 = arith.constant 0 : i32
    return %arg0, %c0_i32 : i32, i32
  }
}

</mosaic_0001>

<bundles_post_ra>
// kernel: tpu_custom_call.1
= control target key start
LH: loop header
LB: loop body
LE: loop exit
PB: predicated region body
PF: predicated region fallthrough
CT: control target
= control target key end

     0   :  { %12 = vsyncpa [#allocation3], 0  ;;  %s1660_s0 = inlined_call_operand.hbm [shape: f32[128,128], index: 0, kind: input, shape index: {}]   ;;  %s1661_s1 = inlined_call_operand.hbm [shape: f32[128,128], index: 1, kind: input, shape index: {}]   ;;  %s1662_s2 = inlined_call_operand.vmem [shape: f32[1,128], index: 2, kind: input, shape index: {}]   ;;  %s1663_s3 = inlined_call_operand.hbm [shape: f32[2,128,128], index: 3, kind: input, shape index: {}]   ;;  %s1664_s4 = inlined_call_operand.vmem [shape: f32[2,1,128], index: 4, kind: input, shape index: {}]   ;;  %s1665_s5 = inlined_call_operand.hbm [shape: f32[128,128], index: 5, kind: input, shape index: {}]   ;;  %s1666_s6 = inlined_call_operand.vmem [shape: f32[1,128], index: 6, kind: input, shape index: {}]   ;;  %s1667_s7 = inlined_call_operand.hbm [shape: f32[128,128], index: 7, kind: output, shape index: {}]  }
   0x1   :  { %13 = vsyncpa [#allocation6], 0 }
   0x2   :  { %14 = vsyncpa [#allocation9], 0 }
   0x3   :  { %15 = vsyncpa [#allocation4], 0  ;;  %s1359_s24 = smov [#allocation5]   ;;  %s1360_s26 = smov [#allocation2]  }
   0x4   :  { %s33_s25 = sshll.u32 %s1359_s24, 4  ;;  %s21_s27 = sshll.u32 %s1360_s26, 4  ;;  %s34_s25 = int_to_ptr.vmem [resolvable:$true] %s33_s25  ;;  %s22_s27 = int_to_ptr.vmem [resolvable:$true] %s21_s27 }
   0x5   :  { %s1259_s28 = scalar_lea.vmem %s34_s25, 2048  ;;  %p1264_p1 = scmp.lt.s32.totalorder %s34_s25, %s34_s25 }
   0x6   :  { %p1260_p0 = scmp.ne.s32.totalorder %s34_s25, %s1259_s28  ;;  %p1265_p2 = scmp.lt.s32.totalorder %s1259_s28, %s1259_s28 }
   0x8   :  { %p1266_p3 = por %p1265_p2, %p1264_p1 }
   0xa   :  { %p1267_p4 = pnand %p1266_p3, %p1260_p0 }
   0xc   :  { %1270 = shalt.err (!%p1267_p4)
}
   0xd   :  { %s1361_s29 = smov 128   ;;  %s1362_s30 = smov 8  }
   0xe   :  { %39 = dma.hbm_to_vmem [thread:$0]  %s1661_s1, 2048, %s34_s25, [#allocation6], %s1361_s29, %s1361_s29, %s1362_s30  }
   0xf   :  { %s1279_s10 = scalar_lea.vmem %s22_s27, 2048  ;;  %p1284_p6 = scmp.lt.s32.totalorder %s22_s27, %s22_s27 }
  0x10   :  { %p1280_p5 = scmp.ne.s32.totalorder %s22_s27, %s1279_s10  ;;  %p1285_p7 = scmp.lt.s32.totalorder %s1279_s10, %s1279_s10 }
  0x12   :  { %p1286_p8 = por %p1285_p7, %p1284_p6 }
  0x14   :  { %p1287_p9 = pnand %p1286_p8, %p1280_p5 }
  0x16   :  { %1290 = shalt.err (!%p1287_p9)
}
  0x17   :  { %27 = dma.hbm_to_vmem [thread:$0]  %s1660_s0, 2048, %s22_s27, [#allocation3], %s1361_s29, %s1361_s29, %s1362_s30  }
  0x18   :  { %s1363_s13 = smov [#allocation7]   ;;  %s1364_s15 = smov [#allocation8]  }
  0x19   :  { %s47_s14 = sshll.u32 %s1363_s13, 4  ;;  %s61_s16 = sshll.u32 %s1364_s15, 4  ;;  %s48_s14 = int_to_ptr.vmem [resolvable:$true] %s47_s14  ;;  %s62_s16 = int_to_ptr.vmem [resolvable:$true] %s61_s16 }
  0x1a   :  { %s1299_s1 = scalar_lea.vmem %s48_s14, 4096  ;;  %p1304_p11 = scmp.lt.s32.totalorder %s48_s14, %s48_s14 }
  0x1b   :  { %p1300_p10 = scmp.ne.s32.totalorder %s48_s14, %s1299_s1  ;;  %p1305_p12 = scmp.lt.s32.totalorder %s1299_s1, %s1299_s1 }
  0x1d   :  { %p1306_p13 = por %p1305_p12, %p1304_p11 }
  0x1f   :  { %p1307_p0 = pnand %p1306_p13, %p1300_p10 }
  0x21   :  { %1310 = shalt.err (!%p1307_p0)
}
  0x22   :  { %53 = dma.hbm_to_vmem [thread:$0]  %s1663_s3, 4096, %s48_s14, [#allocation6], %s1361_s29, %s1361_s29, %s1362_s30  }
  0x23   :  { %s1319_s0 = scalar_lea.vmem %s62_s16, 2048  ;;  %p1324_p2 = scmp.lt.s32.totalorder %s62_s16, %s62_s16 }
  0x24   :  { %p1320_p1 = scmp.ne.s32.totalorder %s62_s16, %s1319_s0  ;;  %p1325_p3 = scmp.lt.s32.totalorder %s1319_s0, %s1319_s0 }
  0x26   :  { %p1326_p4 = por %p1325_p3, %p1324_p2 }
  0x28   :  { %p1327_p5 = pnand %p1326_p4, %p1320_p1 }
  0x2a   :  { %1330 = shalt.err (!%p1327_p5)
}
  0x2b   :  { %67 = dma.hbm_to_vmem [thread:$0]  %s1665_s5, 2048, %s62_s16, [#allocation9], %s1361_s29, %s1361_s29, %s1362_s30  }
  0x2c   :  { %1351 = dma.done.wait [#allocation3], 2048  }
  0x2d   :  { %1352 = vsyncadd [#allocation3], 4294965248 }
  0x2e   :  { %1353 = dma.done.wait [#allocation6], 6144  }
  0x2f   :  { %1354 = vsyncadd [#allocation6], 4294961152 }
  0x30   :  { %1355 = dma.done.wait [#allocation9], 2048  }
  0x31   :  { %1356 = vsyncadd [#allocation9], 4294965248  ;;  %v113_v0 = vld [vmem:[#allocation5 + $0x78] sm:$0xff]  ;;  %v112_v1 = vld [vmem:[#allocation5 + $0x70] sm:$0xff] }
  0x32   :  { %1020 = vmatprep.subr.mxu0 %v113_v0  ;;  %v111_v2 = vld [vmem:[#allocation5 + $0x68] sm:$0xff]  ;;  %v110_v3 = vld [vmem:[#allocation5 + $0x60] sm:$0xff]  ;;  %v109_v5 = vld [vmem:[#allocation5 + $0x58] sm:$0xff] }
  0x33   :  { %1021 = vmatpush3.msra.mxu0 %v113_v0  ;;  %v82_v4 = vld [vmem:[#allocation2] sm:$0xff]  ;;  %v108_v6 = vld [vmem:[#allocation5 + $0x50] sm:$0xff]  ;;  %v107_v7 = vld [vmem:[#allocation5 + $0x48] sm:$0xff] }
  0x34   :  { %1022 = vmatprep.subr.mxu0 %v112_v1  ;;  %1052 = vmatprep.mubr.f32.mxu0 %v82_v4  ;;  %v297_v8 = vld [vmem:[#allocation7 + $0x78] sm:$0xff]  ;;  %v296_v9 = vld [vmem:[#allocation7 + $0x70] sm:$0xff]  ;;  %v106_v10 = vld [vmem:[#allocation5 + $0x40] sm:$0xff] }
  0x35   :  { %1023 = vmatpush3.msra.mxu0 %v112_v1  ;;  %1076 = vmatprep.subr.mxu1 %v297_v8  ;;  %v295_v11 = vld [vmem:[#allocation7 + $0x68] sm:$0xff]  ;;  %v105_v12 = vld [vmem:[#allocation5 + $0x38] sm:$0xff]  ;;  %v294_v13 = vld [vmem:[#allocation7 + $0x60] sm:$0xff] }
  0x36   :  { %1024 = vmatprep.subr.mxu0 %v111_v2  ;;  %1077 = vmatpush3.msra.mxu1 %v297_v8  ;;  %v104_v14 = vld [vmem:[#allocation5 + $0x30] sm:$0xff]  ;;  %v293_v15 = vld [vmem:[#allocation7 + $0x58] sm:$0xff]  ;;  %v103_v16 = vld [vmem:[#allocation5 + $0x28] sm:$0xff] }
  0x37   :  { %1025 = vmatpush3.msra.mxu0 %v111_v2  ;;  %1078 = vmatprep.subr.mxu1 %v296_v9  ;;  %v292_v17 = vld [vmem:[#allocation7 + $0x50] sm:$0xff]  ;;  %v102_v18 = vld [vmem:[#allocation5 + $0x20] sm:$0xff]  ;;  %v291_v19 = vld [vmem:[#allocation7 + $0x48] sm:$0xff] }
  0x38   :  { %1026 = vmatprep.subr.mxu0 %v110_v3  ;;  %1079 = vmatpush3.msra.mxu1 %v296_v9  ;;  %v101_v20 = vld [vmem:[#allocation5 + $0x18] sm:$0xff]  ;;  %v290_v21 = vld [vmem:[#allocation7 + $0x40] sm:$0xff]  ;;  %v100_v22 = vld [vmem:[#allocation5 + $0x10] sm:$0xff] }
  0x39   :  { %1027 = vmatpush3.msra.mxu0 %v110_v3  ;;  %1080 = vmatprep.subr.mxu1 %v295_v11  ;;  %v289_v23 = vld [vmem:[#allocation7 + $0x38] sm:$0xff]  ;;  %v99_v24 = vld [vmem:[#allocation5 + $0x8] sm:$0xff]  ;;  %v288_v25 = vld [vmem:[#allocation7 + $0x30] sm:$0xff] }
  0x3a   :  { %1028 = vmatprep.subr.mxu0 %v109_v5  ;;  %1081 = vmatpush3.msra.mxu1 %v295_v11  ;;  %v98_v26 = vld [vmem:[#allocation5] sm:$0xff]  ;;  %v287_v27 = vld [vmem:[#allocation7 + $0x28] sm:$0xff]  ;;  %v84_v30 = vld [vmem:[#allocation2 + $0x10] sm:$0xff] }
  0x3b   :  { %1029 = vmatpush3.msra.mxu0 %v109_v5  ;;  %1082 = vmatprep.subr.mxu1 %v294_v13  ;;  %v83_v28 = vld [vmem:[#allocation2 + $0x8] sm:$0xff]  ;;  %v286_v29 = vld [vmem:[#allocation7 + $0x20] sm:$0xff]  ;;  %v85_v31 = vld [vmem:[#allocation2 + $0x18] sm:$0xff] }
  0x3c   :  { %1030 = vmatprep.subr.mxu0 %v108_v6  ;;  %1083 = vmatpush3.msra.mxu1 %v294_v13  ;;  %v86_v32 = vld [vmem:[#allocation2 + $0x20] sm:$0xff]  ;;  %v87_v33 = vld [vmem:[#allocation2 + $0x28] sm:$0xff]  ;;  %v88_v34 = vld [vmem:[#allocation2 + $0x30] sm:$0xff] }
  0x3d   :  { %1031 = vmatpush3.msra.mxu0 %v108_v6  ;;  %1084 = vmatprep.subr.mxu1 %v293_v15  ;;  %v89_v35 = vld [vmem:[#allocation2 + $0x38] sm:$0xff]  ;;  %v90_v36 = vld [vmem:[#allocation2 + $0x40] sm:$0xff]  ;;  %v91_v37 = vld [vmem:[#allocation2 + $0x48] sm:$0xff] }
  0x3e   :  { %1032 = vmatprep.subr.mxu0 %v107_v7  ;;  %1085 = vmatpush3.msra.mxu1 %v293_v15  ;;  %v92_v38 = vld [vmem:[#allocation2 + $0x50] sm:$0xff]  ;;  %v93_v39 = vld [vmem:[#allocation2 + $0x58] sm:$0xff]  ;;  %v94_v40 = vld [vmem:[#allocation2 + $0x60] sm:$0xff] }
  0x3f   :  { %1033 = vmatpush3.msra.mxu0 %v107_v7  ;;  %1086 = vmatprep.subr.mxu1 %v292_v17  ;;  %v95_v41 = vld [vmem:[#allocation2 + $0x68] sm:$0xff]  ;;  %v96_v42 = vld [vmem:[#allocation2 + $0x70] sm:$0xff]  ;;  %v97_v43 = vld [vmem:[#allocation2 + $0x78] sm:$0xff] }
  0x40   :  { %1034 = vmatprep.subr.mxu0 %v106_v10  ;;  %1087 = vmatpush3.msra.mxu1 %v292_v17  ;;  %v285_v44 = vld [vmem:[#allocation7 + $0x18] sm:$0xff]  ;;  %v284_v45 = vld [vmem:[#allocation7 + $0x10] sm:$0xff]  ;;  %v283_v46 = vld [vmem:[#allocation7 + $0x8] sm:$0xff] }
  0x41   :  { %1035 = vmatpush3.msra.mxu0 %v106_v10  ;;  %1088 = vmatprep.subr.mxu1 %v291_v19  ;;  %v282_v47 = vld [vmem:[#allocation7] sm:$0xff]  ;;  %v498_v48 = vld [vmem:[#allocation7 + $0xf8] sm:$0xff]  ;;  %v497_v49 = vld [vmem:[#allocation7 + $0xf0] sm:$0xff] }
  0x42   :  { %1036 = vmatprep.subr.mxu0 %v105_v12  ;;  %1089 = vmatpush3.msra.mxu1 %v291_v19  ;;  %v496_v50 = vld [vmem:[#allocation7 + $0xe8] sm:$0xff]  ;;  %v495_v51 = vld [vmem:[#allocation7 + $0xe0] sm:$0xff]  ;;  %v494_v52 = vld [vmem:[#allocation7 + $0xd8] sm:$0xff] }
  0x43   :  { %1037 = vmatpush3.msra.mxu0 %v105_v12  ;;  %1090 = vmatprep.subr.mxu1 %v290_v21  ;;  %v493_v53 = vld [vmem:[#allocation7 + $0xd0] sm:$0xff]  ;;  %v492_v54 = vld [vmem:[#allocation7 + $0xc8] sm:$0xff]  ;;  %v491_v55 = vld [vmem:[#allocation7 + $0xc0] sm:$0xff] }
  0x44   :  { %1038 = vmatprep.subr.mxu0 %v104_v14  ;;  %1091 = vmatpush3.msra.mxu1 %v290_v21  ;;  %v490_v56 = vld [vmem:[#allocation7 + $0xb8] sm:$0xff]  ;;  %v489_v57 = vld [vmem:[#allocation7 + $0xb0] sm:$0xff]  ;;  %v488_v58 = vld [vmem:[#allocation7 + $0xa8] sm:$0xff] }
  0x45   :  { %1039 = vmatpush3.msra.mxu0 %v104_v14  ;;  %1092 = vmatprep.subr.mxu1 %v289_v23  ;;  %v487_v59 = vld [vmem:[#allocation7 + $0xa0] sm:$0xff] }
  0x46   :  { %1040 = vmatprep.subr.mxu0 %v103_v16  ;;  %1093 = vmatpush3.msra.mxu1 %v289_v23  ;;  %v887_v60 = vld [vmem:[%s1662_s2] ss:$0 sm:$0xff] }
  0x47   :  { %1041 = vmatpush3.msra.mxu0 %v103_v16  ;;  %1094 = vmatprep.subr.mxu1 %v288_v25 }
  0x48   :  { %1042 = vmatprep.subr.mxu0 %v102_v18  ;;  %1095 = vmatpush3.msra.mxu1 %v288_v25 }
  0x49   :  { %1043 = vmatpush3.msra.mxu0 %v102_v18  ;;  %1096 = vmatprep.subr.mxu1 %v287_v27 }
  0x4a   :  { %1044 = vmatprep.subr.mxu0 %v101_v20  ;;  %1097 = vmatpush3.msra.mxu1 %v287_v27 }
  0x4b   :  { %1045 = vmatpush3.msra.mxu0 %v101_v20  ;;  %1098 = vmatprep.subr.mxu1 %v286_v29 }
  0x4c   :  { %1046 = vmatprep.subr.mxu0 %v100_v22  ;;  %1099 = vmatpush3.msra.mxu1 %v286_v29 }
  0x4d   :  { %1047 = vmatpush3.msra.mxu0 %v100_v22  ;;  %1100 = vmatprep.subr.mxu1 %v285_v44 }
  0x4e   :  { %1048 = vmatprep.subr.mxu0 %v99_v24  ;;  %1101 = vmatpush3.msra.mxu1 %v285_v44 }
  0x4f   :  { %1049 = vmatpush3.msra.mxu0 %v99_v24  ;;  %1102 = vmatprep.subr.mxu1 %v284_v45 }
  0x50   :  { %1050 = vmatprep.subr.mxu0 %v98_v26  ;;  %1103 = vmatpush3.msra.mxu1 %v284_v45  ;;  %v486_v45 = vld [vmem:[#allocation7 + $0x98] sm:$0xff] }
  0x51   :  { %1051 = vmatpush3.msra.mxu0 %v98_v26  ;;  %1104 = vmatprep.subr.mxu1 %v283_v46 }
  0x52   :  { %1053 = vmatmul.mubr.f32.vlgmr.msra.gmra.mxu0 %v83_v28  ;;  %1105 = vmatpush3.msra.mxu1 %v283_v46  ;;  %v485_v46 = vld [vmem:[#allocation7 + $0x90] sm:$0xff] }
  0x53   :  { %1055 = vmatprep.mubr.f32.mxu0 %v84_v30  ;;  %1106 = vmatprep.subr.mxu1 %v282_v47 }
  0x54   :  { %1107 = vmatpush3.msra.mxu1 %v282_v47  ;;  %1132 = vmatprep.subr.mxu0 %v498_v48  ;;  %v484_v47 = vld [vmem:[#allocation7 + $0x88] sm:$0xff] }
  0x55   :  { %1133 = vmatpush3.msra.mxu0 %v498_v48  ;;  %v483_v48 = vld [vmem:[#allocation7 + $0x80] sm:$0xff] }
  0x56   :  { %1056 = vmatmul.mubr.f32.gmra.mxu0 %v85_v31  ;;  %1134 = vmatprep.subr.mxu0 %v497_v49 }
  0x57   :  { %1058 = vmatprep.mubr.f32.mxu0 %v86_v32  ;;  %1135 = vmatpush3.msra.mxu0 %v497_v49  ;;  %v699_v49 = vld [vmem:[#allocation8 + $0x78] sm:$0xff] }
  0x58   :  { %1136 = vmatprep.subr.mxu0 %v496_v50  ;;  %1188 = vmatprep.subr.mxu1 %v699_v49 }
  0x59   :  { %1137 = vmatpush3.msra.mxu0 %v496_v50  ;;  %v698_v50 = vld [vmem:[#allocation8 + $0x70] sm:$0xff] }
  0x5a   :  { %1059 = vmatmul.mubr.f32.gmra.mxu0 %v87_v33  ;;  %1138 = vmatprep.subr.mxu0 %v495_v51 }
  0x5b   :  { %1061 = vmatprep.mubr.f32.mxu0 %v88_v34  ;;  %1139 = vmatpush3.msra.mxu0 %v495_v51  ;;  %v697_v51 = vld [vmem:[#allocation8 + $0x68] sm:$0xff] }
  0x5c   :  { %1140 = vmatprep.subr.mxu0 %v494_v52 }
  0x5d   :  { %1141 = vmatpush3.msra.mxu0 %v494_v52  ;;  %v696_v52 = vld [vmem:[#allocation8 + $0x60] sm:$0xff] }
  0x5e   :  { %1062 = vmatmul.mubr.f32.gmra.mxu0 %v89_v35  ;;  %1142 = vmatprep.subr.mxu0 %v493_v53 }
  0x5f   :  { %1064 = vmatprep.mubr.f32.mxu0 %v90_v36  ;;  %1143 = vmatpush3.msra.mxu0 %v493_v53  ;;  %v695_v53 = vld [vmem:[#allocation8 + $0x58] sm:$0xff] }
  0x60   :  { %1144 = vmatprep.subr.mxu0 %v492_v54 }
  0x61   :  { %1145 = vmatpush3.msra.mxu0 %v492_v54  ;;  %v694_v54 = vld [vmem:[#allocation8 + $0x50] sm:$0xff] }
  0x62   :  { %1065 = vmatmul.mubr.f32.gmra.mxu0 %v91_v37  ;;  %1146 = vmatprep.subr.mxu0 %v491_v55 }
  0x63   :  { %1067 = vmatprep.mubr.f32.mxu0 %v92_v38  ;;  %1147 = vmatpush3.msra.mxu0 %v491_v55  ;;  %v693_v55 = vld [vmem:[#allocation8 + $0x48] sm:$0xff] }
  0x64   :  { %1148 = vmatprep.subr.mxu0 %v490_v56 }
  0x65   :  { %1149 = vmatpush3.msra.mxu0 %v490_v56  ;;  %v692_v56 = vld [vmem:[#allocation8 + $0x40] sm:$0xff] }
  0x66   :  { %1068 = vmatmul.mubr.f32.gmra.mxu0 %v93_v39  ;;  %1150 = vmatprep.subr.mxu0 %v489_v57 }
  0x67   :  { %1070 = vmatprep.mubr.f32.mxu0 %v94_v40  ;;  %1151 = vmatpush3.msra.mxu0 %v489_v57  ;;  %v691_v57 = vld [vmem:[#allocation8 + $0x38] sm:$0xff] }
  0x68   :  { %1152 = vmatprep.subr.mxu0 %v488_v58 }
  0x69   :  { %1153 = vmatpush3.msra.mxu0 %v488_v58  ;;  %v690_v58 = vld [vmem:[#allocation8 + $0x30] sm:$0xff] }
  0x6a   :  { %1071 = vmatmul.mubr.f32.gmra.mxu0 %v95_v41  ;;  %1154 = vmatprep.subr.mxu0 %v487_v59 }
  0x6b   :  { %1073 = vmatprep.mubr.f32.mxu0 %v96_v42  ;;  %1155 = vmatpush3.msra.mxu0 %v487_v59  ;;  %v689_v59 = vld [vmem:[#allocation8 + $0x28] sm:$0xff] }
  0x6c   :  { %1156 = vmatprep.subr.mxu0 %v486_v45 }
  0x6d   :  { %1157 = vmatpush3.msra.mxu0 %v486_v45 }
  0x6e   :  { %1074 = vmatmul.mubr.f32.gmra.mxu0 %v97_v43  ;;  %1158 = vmatprep.subr.mxu0 %v485_v46 }
  0x6f   :  { %1159 = vmatpush3.msra.mxu0 %v485_v46 }
  0x70   :  { %1160 = vmatprep.subr.mxu0 %v484_v47 }
  0x71   :  { %1161 = vmatpush3.msra.mxu0 %v484_v47 }
  0x72   :  { %1162 = vmatprep.subr.mxu0 %v483_v48 }
  0x73   :  { %1163 = vmatpush3.msra.mxu0 %v483_v48 }
 0x112   :  { %v1054_v61 = vpop.f32.mrf.mxu0 }
 0x113   :  { %v1433_v62 = vadd.f32 %v1054_v61, %v887_v60  ;;  %v1516_v61 = vld [vmem:[%s1664_s4] ss:$0 sm:$0xff] }
 0x114   :  { %v187_v63 = vpop.f32.mrf.mxu0 }
 0x115   :  { %v1435_v0 = vadd.f32 %v887_v60, %v187_v63  ;;  %v267_v3 = vmax.f32 %v1433_v62, 0.0 }
 0x116   :  { %v1057_v1 = vpop.f32.mrf.mxu0 }
 0x117   :  { %v266_v2 = vmax.f32 %v1435_v0, 0.0  ;;  %v1439_v4 = vadd.f32 %v1057_v1, %v887_v60 }
 0x118   :  { %v197_v5 = vpop.f32.mrf.mxu0 }
 0x119   :  { %v1441_v6 = vadd.f32 %v887_v60, %v197_v5  ;;  %1108 = vmatprep.mubr.f32.mxu1 %v266_v2  ;;  %v269_v9 = vmax.f32 %v1439_v4, 0.0 }
 0x11a   :  { %v1060_v7 = vpop.f32.mrf.mxu0  ;;  %1109 = vmatmul.mubr.f32.vlgmr.msra.gmra.mxu1 %v267_v3 }
 0x11b   :  { %v268_v8 = vmax.f32 %v1441_v6, 0.0  ;;  %v1449_v10 = vadd.f32 %v1060_v7, %v887_v60  ;;  %1189 = vmatpush3.msra.mxu1 %v699_v49 }
 0x11c   :  { %v207_v11 = vpop.f32.mrf.mxu0  ;;  %1190 = vmatprep.subr.mxu1 %v698_v50 }
 0x11d   :  { %v1451_v12 = vadd.f32 %v887_v60, %v207_v11  ;;  %1111 = vmatprep.mubr.f32.mxu1 %v268_v8  ;;  %v271_v15 = vmax.f32 %v1449_v10, 0.0  ;;  %1191 = vmatpush3.msra.mxu1 %v698_v50 }
 0x11e   :  { %v1063_v13 = vpop.f32.mrf.mxu0  ;;  %1112 = vmatmul.mubr.f32.gmra.mxu1 %v269_v9  ;;  %1192 = vmatprep.subr.mxu1 %v697_v51 }
 0x11f   :  { %v270_v14 = vmax.f32 %v1451_v12, 0.0  ;;  %v1459_v16 = vadd.f32 %v1063_v13, %v887_v60  ;;  %1193 = vmatpush3.msra.mxu1 %v697_v51 }
 0x120   :  { %v217_v17 = vpop.f32.mrf.mxu0  ;;  %1194 = vmatprep.subr.mxu1 %v696_v52 }
 0x121   :  { %v1461_v18 = vadd.f32 %v887_v60, %v217_v17  ;;  %1114 = vmatprep.mubr.f32.mxu1 %v270_v14  ;;  %v273_v21 = vmax.f32 %v1459_v16, 0.0  ;;  %1195 = vmatpush3.msra.mxu1 %v696_v52 }
 0x122   :  { %v1066_v19 = vpop.f32.mrf.mxu0  ;;  %1115 = vmatmul.mubr.f32.gmra.mxu1 %v271_v15  ;;  %1196 = vmatprep.subr.mxu1 %v695_v53 }
 0x123   :  { %v272_v20 = vmax.f32 %v1461_v18, 0.0  ;;  %v1469_v22 = vadd.f32 %v1066_v19, %v887_v60  ;;  %1197 = vmatpush3.msra.mxu1 %v695_v53 }
 0x124   :  { %v227_v23 = vpop.f32.mrf.mxu0  ;;  %1198 = vmatprep.subr.mxu1 %v694_v54 }
 0x125   :  { %v1471_v24 = vadd.f32 %v887_v60, %v227_v23  ;;  %1117 = vmatprep.mubr.f32.mxu1 %v272_v20  ;;  %v275_v27 = vmax.f32 %v1469_v22, 0.0  ;;  %1199 = vmatpush3.msra.mxu1 %v694_v54 }
 0x126   :  { %v1069_v25 = vpop.f32.mrf.mxu0  ;;  %1118 = vmatmul.mubr.f32.gmra.mxu1 %v273_v21  ;;  %1200 = vmatprep.subr.mxu1 %v693_v55 }
 0x127   :  { %v274_v26 = vmax.f32 %v1471_v24, 0.0  ;;  %v1479_v28 = vadd.f32 %v1069_v25, %v887_v60  ;;  %1201 = vmatpush3.msra.mxu1 %v693_v55 }
 0x128   :  { %v237_v29 = vpop.f32.mrf.mxu0  ;;  %1202 = vmatprep.subr.mxu1 %v692_v56 }
 0x129   :  { %v1481_v30 = vadd.f32 %v887_v60, %v237_v29  ;;  %1120 = vmatprep.mubr.f32.mxu1 %v274_v26  ;;  %v277_v33 = vmax.f32 %v1479_v28, 0.0  ;;  %1203 = vmatpush3.msra.mxu1 %v692_v56 }
 0x12a   :  { %v1072_v31 = vpop.f32.mrf.mxu0  ;;  %1121 = vmatmul.mubr.f32.gmra.mxu1 %v275_v27  ;;  %1204 = vmatprep.subr.mxu1 %v691_v57 }
 0x12b   :  { %v276_v32 = vmax.f32 %v1481_v30, 0.0  ;;  %v1489_v34 = vadd.f32 %v1072_v31, %v887_v60  ;;  %1205 = vmatpush3.msra.mxu1 %v691_v57 }
 0x12c   :  { %v247_v35 = vpop.f32.mrf.mxu0  ;;  %1206 = vmatprep.subr.mxu1 %v690_v58 }
 0x12d   :  { %v1491_v36 = vadd.f32 %v887_v60, %v247_v35  ;;  %1123 = vmatprep.mubr.f32.mxu1 %v276_v32  ;;  %v279_v39 = vmax.f32 %v1489_v34, 0.0  ;;  %1207 = vmatpush3.msra.mxu1 %v690_v58  ;;  %v687_v34 = vld [vmem:[#allocation8 + $0x18] sm:$0xff] }
 0x12e   :  { %v1075_v37 = vpop.f32.mrf.mxu0  ;;  %1124 = vmatmul.mubr.f32.gmra.mxu1 %v277_v33  ;;  %1208 = vmatprep.subr.mxu1 %v689_v59 }
 0x12f   :  { %v278_v38 = vmax.f32 %v1491_v36, 0.0  ;;  %v1499_v40 = vadd.f32 %v1075_v37, %v887_v60  ;;  %1209 = vmatpush3.msra.mxu1 %v689_v59 }
 0x130   :  { %v257_v41 = vpop.f32.mrf.mxu0 }
 0x131   :  { %v1501_v42 = vadd.f32 %v887_v60, %v257_v41  ;;  %1126 = vmatprep.mubr.f32.mxu1 %v278_v38  ;;  %v281_v44 = vmax.f32 %v1499_v40, 0.0  ;;  %v688_v60 = vld [vmem:[#allocation8 + $0x20] sm:$0xff] }
 0x132   :  { %1127 = vmatmul.mubr.f32.gmra.mxu1 %v279_v39  ;;  %1210 = vmatprep.subr.mxu1 %v688_v60  ;;  %v1617_v40 = vld [vmem:[%s1664_s4 + $0x1] ss:$0 sm:$0xff] }
 0x133   :  { %v280_v43 = vmax.f32 %v1501_v42, 0.0  ;;  %1211 = vmatpush3.msra.mxu1 %v688_v60  ;;  %v684_v42 = vld [vmem:[#allocation8] sm:$0xff] }
 0x134   :  { %1212 = vmatprep.subr.mxu1 %v687_v34 }
 0x135   :  { %1129 = vmatprep.mubr.f32.mxu1 %v280_v43  ;;  %1213 = vmatpush3.msra.mxu1 %v687_v34 }
 0x136   :  { %1130 = vmatmul.mubr.f32.gmra.mxu1 %v281_v44 }
 0x1da   :  { %v1110_v63 = vpop.f32.mrf.mxu1 }
 0x1db   :  { %v377_v1 = vadd.f32 %v1110_v63, %v1516_v61 }
 0x1dc   :  { %v371_v5 = vpop.f32.mrf.mxu1 }
 0x1dd   :  { %v372_v7 = vadd.f32 %v1516_v61, %v371_v5  ;;  %v451_v11 = vmax.f32 %v377_v1, 0.0 }
 0x1de   :  { %v1113_v13 = vpop.f32.mrf.mxu1 }
 0x1df   :  { %v450_v17 = vmax.f32 %v372_v7, 0.0  ;;  %v387_v19 = vadd.f32 %v1113_v13, %v1516_v61  ;;  %v1528_v31 = vadd.f32 %v451_v11, %v267_v3 }
 0x1e0   :  { %v381_v23 = vpop.f32.mrf.mxu1 }
 0x1e1   :  { %v1523_v25 = vadd.f32 %v450_v17, %v266_v2  ;;  %v382_v29 = vadd.f32 %v1516_v61, %v381_v23  ;;  %v453_v35 = vmax.f32 %v387_v19, 0.0 }
 0x1e2   :  { %v1116_v37 = vpop.f32.mrf.mxu1 }
 0x1e3   :  { %v452_v41 = vmax.f32 %v382_v29, 0.0  ;;  %v397_v45 = vadd.f32 %v1116_v37, %v1516_v61  ;;  %1164 = vmatprep.mubr.f32.mxu0 %v1523_v25  ;;  %v1540_v62 = vadd.f32 %v453_v35, %v269_v9 }
 0x1e4   :  { %v391_v46 = vpop.f32.mrf.mxu1  ;;  %1165 = vmatmul.mubr.f32.vlgmr.msra.gmra.mxu0 %v1528_v31 }
 0x1e5   :  { %v1535_v0 = vadd.f32 %v452_v41, %v268_v8  ;;  %v392_v2 = vadd.f32 %v1516_v61, %v391_v46  ;;  %v455_v3 = vmax.f32 %v397_v45, 0.0 }
 0x1e6   :  { %v1119_v47 = vpop.f32.mrf.mxu1 }
 0x1e7   :  { %v454_v48 = vmax.f32 %v392_v2, 0.0  ;;  %v407_v49 = vadd.f32 %v1119_v47, %v1516_v61  ;;  %1167 = vmatprep.mubr.f32.mxu0 %v1535_v0  ;;  %v1552_v4 = vadd.f32 %v455_v3, %v271_v15 }
 0x1e8   :  { %v401_v50 = vpop.f32.mrf.mxu1  ;;  %1168 = vmatmul.mubr.f32.gmra.mxu0 %v1540_v62 }
 0x1e9   :  { %v1547_v6 = vadd.f32 %v454_v48, %v270_v14  ;;  %v402_v8 = vadd.f32 %v1516_v61, %v401_v50  ;;  %v457_v9 = vmax.f32 %v407_v49, 0.0 }
 0x1ea   :  { %v1122_v51 = vpop.f32.mrf.mxu1 }
 0x1eb   :  { %v456_v52 = vmax.f32 %v402_v8, 0.0  ;;  %v417_v53 = vadd.f32 %v1122_v51, %v1516_v61  ;;  %1170 = vmatprep.mubr.f32.mxu0 %v1547_v6  ;;  %v1564_v10 = vadd.f32 %v457_v9, %v273_v21 }
 0x1ec   :  { %v411_v54 = vpop.f32.mrf.mxu1  ;;  %1171 = vmatmul.mubr.f32.gmra.mxu0 %v1552_v4 }
 0x1ed   :  { %v1559_v12 = vadd.f32 %v456_v52, %v272_v20  ;;  %v412_v14 = vadd.f32 %v1516_v61, %v411_v54  ;;  %v459_v15 = vmax.f32 %v417_v53, 0.0 }
 0x1ee   :  { %v1125_v55 = vpop.f32.mrf.mxu1 }
 0x1ef   :  { %v458_v56 = vmax.f32 %v412_v14, 0.0  ;;  %v427_v57 = vadd.f32 %v1125_v55, %v1516_v61  ;;  %1173 = vmatprep.mubr.f32.mxu0 %v1559_v12  ;;  %v1576_v16 = vadd.f32 %v459_v15, %v275_v27 }
 0x1f0   :  { %v421_v58 = vpop.f32.mrf.mxu1  ;;  %1174 = vmatmul.mubr.f32.gmra.mxu0 %v1564_v10 }
 0x1f1   :  { %v1571_v18 = vadd.f32 %v458_v56, %v274_v26  ;;  %v422_v20 = vadd.f32 %v1516_v61, %v421_v58  ;;  %v461_v21 = vmax.f32 %v427_v57, 0.0 }
 0x1f2   :  { %v1128_v59 = vpop.f32.mrf.mxu1 }
 0x1f3   :  { %v460_v60 = vmax.f32 %v422_v20, 0.0  ;;  %v437_v63 = vadd.f32 %v1128_v59, %v1516_v61  ;;  %1176 = vmatprep.mubr.f32.mxu0 %v1571_v18  ;;  %v1588_v22 = vadd.f32 %v461_v21, %v277_v33 }
 0x1f4   :  { %v431_v1 = vpop.f32.mrf.mxu1  ;;  %1177 = vmatmul.mubr.f32.gmra.mxu0 %v1576_v16 }
 0x1f5   :  { %v1583_v24 = vadd.f32 %v460_v60, %v276_v32  ;;  %v432_v26 = vadd.f32 %v1516_v61, %v431_v1  ;;  %v463_v27 = vmax.f32 %v437_v63, 0.0 }
 0x1f6   :  { %v1131_v5 = vpop.f32.mrf.mxu1 }
 0x1f7   :  { %v462_v7 = vmax.f32 %v432_v26, 0.0  ;;  %v447_v11 = vadd.f32 %v1131_v5, %v1516_v61  ;;  %1179 = vmatprep.mubr.f32.mxu0 %v1583_v24  ;;  %v1600_v28 = vadd.f32 %v463_v27, %v279_v39  ;;  %v685_v39 = vld [vmem:[#allocation8 + $0x8] sm:$0xff] }
 0x1f8   :  { %v441_v13 = vpop.f32.mrf.mxu1  ;;  %1180 = vmatmul.mubr.f32.gmra.mxu0 %v1588_v22 }
 0x1f9   :  { %v1595_v30 = vadd.f32 %v462_v7, %v278_v38  ;;  %v442_v32 = vadd.f32 %v1516_v61, %v441_v13  ;;  %v465_v33 = vmax.f32 %v447_v11, 0.0  ;;  %v686_v38 = vld [vmem:[#allocation8 + $0x10] sm:$0xff] }
 0x1fa   :  { %1214 = vmatprep.subr.mxu1 %v686_v38 }
 0x1fb   :  { %v464_v17 = vmax.f32 %v442_v32, 0.0  ;;  %1182 = vmatprep.mubr.f32.mxu0 %v1595_v30  ;;  %v1610_v36 = vadd.f32 %v465_v33, %v281_v44  ;;  %1215 = vmatpush3.msra.mxu1 %v686_v38 }
 0x1fc   :  { %1183 = vmatmul.mubr.f32.gmra.mxu0 %v1600_v28  ;;  %1216 = vmatprep.subr.mxu1 %v685_v39 }
 0x1fd   :  { %v1606_v19 = vadd.f32 %v464_v17, %v280_v43  ;;  %1217 = vmatpush3.msra.mxu1 %v685_v39 }
 0x1fe   :  { %1218 = vmatprep.subr.mxu1 %v684_v42 }
 0x1ff   :  { %1185 = vmatprep.mubr.f32.mxu0 %v1606_v19  ;;  %1219 = vmatpush3.msra.mxu1 %v684_v42 }
 0x200   :  { %1186 = vmatmul.mubr.f32.gmra.mxu0 %v1610_v36 }
 0x2a4   :  { %v1166_v43 = vpop.f32.mrf.mxu0 }
 0x2a5   :  { %v579_v44 = vadd.f32 %v1166_v43, %v1617_v40 }
 0x2a6   :  { %v573_v61 = vpop.f32.mrf.mxu0 }
 0x2a7   :  { %v574_v23 = vadd.f32 %v1617_v40, %v573_v61  ;;  %v653_v29 = vmax.f32 %v579_v44, 0.0 }
 0x2a8   :  { %v1169_v35 = vpop.f32.mrf.mxu0 }
 0x2a9   :  { %v652_v37 = vmax.f32 %v574_v23, 0.0  ;;  %v589_v41 = vadd.f32 %v1169_v35, %v1617_v40  ;;  %v669_v3 = vadd.f32 %v653_v29, %v1528_v31  ;;  %v891_v35 = vld [vmem:[%s1666_s6] ss:$0 sm:$0xff]  ;;  %s1365_s6 = smov [#allocation10]  }
 0x2aa   :  { %v583_v45 = vpop.f32.mrf.mxu0  ;;  %s873_s25 = sshll.u32 %s1365_s6, 4  ;;  %s874_s25 = int_to_ptr.vmem [resolvable:$true] %s873_s25 }
 0x2ab   :  { %v668_v46 = vadd.f32 %v652_v37, %v1523_v25  ;;  %v584_v2 = vadd.f32 %v1617_v40, %v583_v45  ;;  %v655_v47 = vmax.f32 %v589_v41, 0.0  ;;  %s1331_s26 = scalar_lea.vmem %s874_s25, 2048  ;;  %p1336_p7 = scmp.lt.s32.totalorder %s874_s25, %s874_s25 }
 0x2ac   :  { %v1172_v48 = vpop.f32.mrf.mxu0  ;;  %p1332_p6 = scmp.ne.s32.totalorder %s874_s25, %s1331_s26  ;;  %p1337_p8 = scmp.lt.s32.totalorder %s1331_s26, %s1331_s26 }
 0x2ad   :  { %v654_v49 = vmax.f32 %v584_v2, 0.0  ;;  %v599_v50 = vadd.f32 %v1172_v48, %v1617_v40  ;;  %1220 = vmatprep.mubr.f32.mxu1 %v668_v46  ;;  %v671_v52 = vadd.f32 %v655_v47, %v1540_v62 }
 0x2ae   :  { %v593_v8 = vpop.f32.mrf.mxu0  ;;  %1221 = vmatmul.mubr.f32.vlgmr.msra.gmra.mxu1 %v669_v3  ;;  %p1338_p9 = por %p1337_p8, %p1336_p7 }
 0x2af   :  { %v670_v9 = vadd.f32 %v654_v49, %v1535_v0  ;;  %v594_v51 = vadd.f32 %v1617_v40, %v593_v8  ;;  %v657_v53 = vmax.f32 %v599_v50, 0.0 }
 0x2b0   :  { %v1175_v25 = vpop.f32.mrf.mxu0  ;;  %p1339_p10 = pnand %p1338_p9, %p1332_p6 }
 0x2b1   :  { %v656_v54 = vmax.f32 %v594_v51, 0.0  ;;  %v609_v14 = vadd.f32 %v1175_v25, %v1617_v40  ;;  %1223 = vmatprep.mubr.f32.mxu1 %v670_v9  ;;  %v673_v56 = vadd.f32 %v657_v53, %v1552_v4 }
 0x2b2   :  { %v603_v31 = vpop.f32.mrf.mxu0  ;;  %1224 = vmatmul.mubr.f32.gmra.mxu1 %v671_v52 }
 0x2b3   :  { %v672_v15 = vadd.f32 %v656_v54, %v1547_v6  ;;  %v604_v55 = vadd.f32 %v1617_v40, %v603_v31  ;;  %v659_v57 = vmax.f32 %v609_v14, 0.0 }
 0x2b4   :  { %v1178_v0 = vpop.f32.mrf.mxu0 }
 0x2b5   :  { %v658_v58 = vmax.f32 %v604_v55, 0.0  ;;  %v619_v20 = vadd.f32 %v1178_v0, %v1617_v40  ;;  %1226 = vmatprep.mubr.f32.mxu1 %v672_v15  ;;  %v675_v60 = vadd.f32 %v659_v57, %v1564_v10 }
 0x2b6   :  { %v613_v62 = vpop.f32.mrf.mxu0  ;;  %1227 = vmatmul.mubr.f32.gmra.mxu1 %v673_v56 }
 0x2b7   :  { %v674_v21 = vadd.f32 %v658_v58, %v1559_v12  ;;  %v614_v59 = vadd.f32 %v1617_v40, %v613_v62  ;;  %v661_v63 = vmax.f32 %v619_v20, 0.0 }
 0x2b8   :  { %v1181_v6 = vpop.f32.mrf.mxu0 }
 0x2b9   :  { %v660_v1 = vmax.f32 %v614_v59, 0.0  ;;  %v629_v26 = vadd.f32 %v1181_v6, %v1617_v40  ;;  %1229 = vmatprep.mubr.f32.mxu1 %v674_v21  ;;  %v677_v7 = vadd.f32 %v661_v63, %v1576_v16 }
 0x2ba   :  { %v623_v4 = vpop.f32.mrf.mxu0  ;;  %1230 = vmatmul.mubr.f32.gmra.mxu1 %v675_v60 }
 0x2bb   :  { %v676_v27 = vadd.f32 %v660_v1, %v1571_v18  ;;  %v624_v5 = vadd.f32 %v1617_v40, %v623_v4  ;;  %v663_v11 = vmax.f32 %v629_v26, 0.0 }
 0x2bc   :  { %v1184_v12 = vpop.f32.mrf.mxu0 }
 0x2bd   :  { %v662_v13 = vmax.f32 %v624_v5, 0.0  ;;  %v639_v32 = vadd.f32 %v1184_v12, %v1617_v40  ;;  %1232 = vmatprep.mubr.f32.mxu1 %v676_v27  ;;  %v679_v34 = vadd.f32 %v663_v11, %v1588_v22 }
 0x2be   :  { %v633_v10 = vpop.f32.mrf.mxu0  ;;  %1233 = vmatmul.mubr.f32.gmra.mxu1 %v677_v7 }
 0x2bf   :  { %v678_v33 = vadd.f32 %v662_v13, %v1583_v24  ;;  %v634_v17 = vadd.f32 %v1617_v40, %v633_v10  ;;  %v665_v38 = vmax.f32 %v639_v32, 0.0 }
 0x2c0   :  { %v1187_v18 = vpop.f32.mrf.mxu0 }
 0x2c1   :  { %v664_v39 = vmax.f32 %v634_v17, 0.0  ;;  %v649_v42 = vadd.f32 %v1187_v18, %v1617_v40  ;;  %1235 = vmatprep.mubr.f32.mxu1 %v678_v33  ;;  %v681_v61 = vadd.f32 %v665_v38, %v1600_v28 }
 0x2c2   :  { %v643_v16 = vpop.f32.mrf.mxu0  ;;  %1236 = vmatmul.mubr.f32.gmra.mxu1 %v679_v34 }
 0x2c3   :  { %v680_v43 = vadd.f32 %v664_v39, %v1595_v30  ;;  %v644_v44 = vadd.f32 %v1617_v40, %v643_v16  ;;  %v667_v23 = vmax.f32 %v649_v42, 0.0 }
 0x2c5   :  { %v666_v24 = vmax.f32 %v644_v44, 0.0  ;;  %1238 = vmatprep.mubr.f32.mxu1 %v680_v43  ;;  %v683_v29 = vadd.f32 %v667_v23, %v1610_v36 }
 0x2c6   :  { %1239 = vmatmul.mubr.f32.gmra.mxu1 %v681_v61 }
 0x2c7   :  { %v682_v22 = vadd.f32 %v666_v24, %v1606_v19 }
 0x2c9   :  { %1241 = vmatprep.mubr.f32.mxu1 %v682_v22 }
 0x2ca   :  { %1242 = vmatmul.mubr.f32.gmra.mxu1 %v683_v29 }
 0x36e   :  { %v1222_v37 = vpop.f32.mrf.mxu1 }
 0x36f   :  { %v779_v30 = vadd.f32 %v1222_v37, %v891_v35 }
 0x370   :  { %v773_v41 = vpop.f32.mrf.mxu1 }
 0x371   :  { %853 = vst [vmem:[#allocation10 + $0x8] sm:$0xff] %v779_v30  ;;  %v774_v40 = vadd.f32 %v891_v35, %v773_v41 }
 0x372   :  { %v1225_v28 = vpop.f32.mrf.mxu1 }
 0x373   :  { %852 = vst [vmem:[#allocation10] sm:$0xff] %v774_v40  ;;  %v789_v45 = vadd.f32 %v1225_v28, %v891_v35 }
 0x374   :  { %v783_v46 = vpop.f32.mrf.mxu1 }
 0x375   :  { %855 = vst [vmem:[#allocation10 + $0x18] sm:$0xff] %v789_v45  ;;  %v784_v2 = vadd.f32 %v891_v35, %v783_v46 }
 0x376   :  { %v1228_v19 = vpop.f32.mrf.mxu1 }
 0x377   :  { %854 = vst [vmem:[#allocation10 + $0x10] sm:$0xff] %v784_v2  ;;  %v799_v36 = vadd.f32 %v1228_v19, %v891_v35 }
 0x378   :  { %v793_v3 = vpop.f32.mrf.mxu1 }
 0x379   :  { %857 = vst [vmem:[#allocation10 + $0x28] sm:$0xff] %v799_v36  ;;  %v794_v47 = vadd.f32 %v891_v35, %v793_v3 }
 0x37a   :  { %v1231_v48 = vpop.f32.mrf.mxu1 }
 0x37b   :  { %856 = vst [vmem:[#allocation10 + $0x20] sm:$0xff] %v794_v47  ;;  %v809_v49 = vadd.f32 %v1231_v48, %v891_v35 }
 0x37c   :  { %v803_v50 = vpop.f32.mrf.mxu1 }
 0x37d   :  { %859 = vst [vmem:[#allocation10 + $0x38] sm:$0xff] %v809_v49  ;;  %v804_v8 = vadd.f32 %v891_v35, %v803_v50 }
 0x37e   :  { %v1234_v9 = vpop.f32.mrf.mxu1 }
 0x37f   :  { %858 = vst [vmem:[#allocation10 + $0x30] sm:$0xff] %v804_v8  ;;  %v819_v51 = vadd.f32 %v1234_v9, %v891_v35 }
 0x380   :  { %v813_v52 = vpop.f32.mrf.mxu1 }
 0x381   :  { %861 = vst [vmem:[#allocation10 + $0x48] sm:$0xff] %v819_v51  ;;  %v814_v53 = vadd.f32 %v891_v35, %v813_v52 }
 0x382   :  { %v1237_v25 = vpop.f32.mrf.mxu1 }
 0x383   :  { %860 = vst [vmem:[#allocation10 + $0x40] sm:$0xff] %v814_v53  ;;  %v829_v54 = vadd.f32 %v1237_v25, %v891_v35 }
 0x384   :  { %v823_v14 = vpop.f32.mrf.mxu1 }
 0x385   :  { %863 = vst [vmem:[#allocation10 + $0x58] sm:$0xff] %v829_v54  ;;  %v824_v31 = vadd.f32 %v891_v35, %v823_v14 }
 0x386   :  { %v1240_v15 = vpop.f32.mrf.mxu1 }
 0x387   :  { %862 = vst [vmem:[#allocation10 + $0x50] sm:$0xff] %v824_v31  ;;  %v839_v55 = vadd.f32 %v1240_v15, %v891_v35 }
 0x388   :  { %v833_v56 = vpop.f32.mrf.mxu1 }
 0x389   :  { %865 = vst [vmem:[#allocation10 + $0x68] sm:$0xff] %v839_v55  ;;  %v834_v57 = vadd.f32 %v891_v35, %v833_v56 }
 0x38a   :  { %v1243_v0 = vpop.f32.mrf.mxu1 }
 0x38b   :  { %864 = vst [vmem:[#allocation10 + $0x60] sm:$0xff] %v834_v57  ;;  %v849_v58 = vadd.f32 %v1243_v0, %v891_v35 }
 0x38c   :  { %v843_v20 = vpop.f32.mrf.mxu1 }
 0x38d   :  { %867 = vst [vmem:[#allocation10 + $0x78] sm:$0xff] %v849_v58  ;;  %v844_v62 = vadd.f32 %v891_v35, %v843_v20 }
 0x38f   :  { %866 = vst [vmem:[#allocation10 + $0x70] sm:$0xff] %v844_v62 }
 0x390   :  { %1342 = shalt.err (!%p1339_p10)
}
 0x391   :  { %879 = dma.vmem_to_hbm [thread:$0]  %s874_s25, 2048, %s1667_s7, [#allocation4], %s1361_s29, %s1361_s29, %s1362_s30  }
 0x392   :  { %1357 = dma.done.wait [#allocation4], 2048  }
 0x393   :  { %1358 = vsyncadd [#allocation4], 4294965248 }
 0x394   :  { %883 = vsyncpa [#allocation3], 1 }
 0x395   :  { %884 = vsyncpa [#allocation6], 1 }
 0x396   :  { %885 = vsyncpa [#allocation9], 1 }
 0x397   :  { %886 = vsyncpa [#allocation4], 1 }

</bundles_post_ra>
